<compile_context>
chip_gen: v7x
topology: tpu7x:2x2x1
jax: 0.10.0
libtpu: 0.0.40
codegen_flags: <defaults>
</compile_context>

<pallas_src>
import jax
import jax.numpy as jnp
from jax.experimental import pallas as pl
from jax.experimental.pallas import tpu as pltpu

CLASS_NUM = 4


def _round_up(n, m):
    return ((n + m - 1) // m) * m


def _fc_kernel(xt_ref, w_ref, b_ref, ot_ref):
    # xt_ref: (F, TB)  activations, transposed -> batch on lanes (lane-dense)
    # w_ref : (F, F)   PyTorch Linear weight, (out_features, in_features)
    # b_ref : (F, 1)   bias as a column
    # ot_ref: (F, TB)  output, transposed
    xt = xt_ref[...]
    w = w_ref[...]
    # out_T[j, :] = sum_k w[j, k] * x_T[k, :] + bias[j]
    # 4 unrolled VPU FMAs on (F, TB) tiles; no MXU involvement.
    acc = w[:, 0:1] * xt[0:1, :]
    for k in range(1, CLASS_NUM):
        acc = acc + w[:, k:k + 1] * xt[k:k + 1, :]
    ot_ref[...] = (acc + b_ref[...]).astype(ot_ref.dtype)


def fake_model_forward(x, weight, bias, *, tile_b=512, min_pallas_batch=128):
    """Forward of FakeModel: Linear(CLASS_NUM, CLASS_NUM) on (B, 1, F), then squeeze(1).

    x:      (B, 1, CLASS_NUM) float32
    weight: (CLASS_NUM, CLASS_NUM)  -- PyTorch Linear convention (out, in)
    bias:   (CLASS_NUM,)
    returns (B, CLASS_NUM)
    """
    B = x.shape[0]
    F = CLASS_NUM
    x2d = x.reshape(B, F)                     # squeeze(1) commutes with the Linear

    # Tiny batches: Pallas launch + DMA overhead dominates; let XLA fuse it.
    if B < min_pallas_batch:
        return x2d @ weight.T + bias

    # Lane-dense layout: put the (large) batch dimension on the 128-lane axis.
    tb = min(tile_b, _round_up(B, 128))       # tile is a multiple of 128 lanes
    b_pad = _round_up(B, tb)
    if b_pad != B:
        x2d = jnp.pad(x2d, ((0, b_pad - B), (0, 0)))
    xt = x2d.T                                # (F, B_pad) -- layout plumbing only
    b_col = bias.reshape(F, 1)

    grid = (b_pad // tb,)
    cost = pl.CostEstimate(
        flops=2 * b_pad * F * F,
        transcendentals=0,
        bytes_accessed=(2 * b_pad * F + F * F + F) * 4,
    )

    out_t = pl.pallas_call(
        _fc_kernel,
        out_shape=jax.ShapeDtypeStruct((F, b_pad), x.dtype),
        grid_spec=pltpu.PrefetchScalarGridSpec(
            num_scalar_prefetch=0,
            grid=grid,
            in_specs=[
                pl.BlockSpec((F, tb), lambda i: (0, i)),   # activations (tiled over batch)
                pl.BlockSpec((F, F), lambda i: (0, 0)),    # weight (resident across grid)
                pl.BlockSpec((F, 1), lambda i: (0, 0)),    # bias   (resident across grid)
            ],
            out_specs=pl.BlockSpec((F, tb), lambda i: (0, i)),
        ),
        compiler_params=pltpu.CompilerParams(
            dimension_semantics=("parallel",),
        ),
        cost_estimate=cost,
    )(xt, weight, b_col)

    return out_t[:, :B].T                     # undo layout plumbing -> (B, F)


if __name__ == "__main__":
    key = jax.random.PRNGKey(0)
    k_x, k_w, k_b = jax.random.split(key, 3)

    # Batch large enough to exercise the Pallas (lane-dense, tiled) path.
    B = 256
    x = jax.random.normal(k_x, (B, 1, CLASS_NUM), dtype=jnp.float32)

    # Deterministic parameter init (matches torch.nn.Linear's U(-1/sqrt(in), 1/sqrt(in))).
    bound = 1.0 / jnp.sqrt(jnp.float32(CLASS_NUM))
    weight = jax.random.uniform(k_w, (CLASS_NUM, CLASS_NUM),
                                minval=-bound, maxval=bound, dtype=jnp.float32)
    bias = jax.random.uniform(k_b, (CLASS_NUM,),
                              minval=-bound, maxval=bound, dtype=jnp.float32)

    out = fake_model_forward(x, weight, bias)
    out = jax.block_until_ready(out)

    # Reference check in plain JAX (same math as the PyTorch forward).
    ref = (x @ weight.T + bias).squeeze(1)
    assert out.shape == (B, CLASS_NUM)
    assert jnp.allclose(out, ref, atol=1e-5, rtol=1e-5)

    # Tiny-batch path (B=2, as in the original test) falls through to XLA fusion.
    x_small = jax.random.normal(k_x, (2, 1, CLASS_NUM), dtype=jnp.float32)
    out_small = jax.block_until_ready(fake_model_forward(x_small, weight, bias))
    ref_small = (x_small @ weight.T + bias).squeeze(1)
    assert out_small.shape == (2, CLASS_NUM)
    assert jnp.allclose(out_small, ref_small, atol=1e-5, rtol=1e-5)

    print("KERNEL_OK")
</pallas_src>

<mosaic_0001>
module attributes {stable_mosaic.version = 11 : i64} {
  func.func @_fc_kernel(%arg0: i32, %arg1: memref<4x256xf32, #tpu.memory_space<vmem>>, %arg2: memref<4x4xf32, #tpu.memory_space<vmem>>, %arg3: memref<4x1xf32, #tpu.memory_space<vmem>>, %arg4: memref<4x256xf32, #tpu.memory_space<vmem>>) attributes {dimension_semantics = [#tpu.dimension_semantics<parallel>], iteration_bounds = array<i64: 1>, scalar_prefetch = 0 : i64, scratch_operands = 0 : i64, tpu.core_type = #tpu.core_type<tc>, window_params = [{transform_indices = @transform_0, window_bounds = array<i64: 4, 256>}, {pipeline_mode = #tpu.pipeline_mode<synchronous>, transform_indices = @transform_1, window_bounds = array<i64: 4, 4>}, {pipeline_mode = #tpu.pipeline_mode<synchronous>, transform_indices = @transform_2, window_bounds = array<i64: 4, 1>}, {transform_indices = @transform_3, window_bounds = array<i64: 4, 256>}]} {
    %c0 = arith.constant 0 : index
    %c0_0 = arith.constant 0 : index
    %0 = vector.load %arg1[%c0, %c0_0] : memref<4x256xf32, #tpu.memory_space<vmem>>, vector<4x256xf32>
    %c0_1 = arith.constant 0 : index
    %c0_2 = arith.constant 0 : index
    %1 = vector.load %arg2[%c0_1, %c0_2] : memref<4x4xf32, #tpu.memory_space<vmem>>, vector<4x4xf32>
    %2 = vector.extract_strided_slice %1 {offsets = [0, 0], sizes = [4, 1], strides = [1, 1]} : vector<4x4xf32> to vector<4x1xf32>
    %3 = vector.extract_strided_slice %0 {offsets = [0, 0], sizes = [1, 256], strides = [1, 1]} : vector<4x256xf32> to vector<1x256xf32>
    %4 = vector.broadcast %2 : vector<4x1xf32> to vector<4x256xf32>
    %5 = vector.broadcast %3 : vector<1x256xf32> to vector<4x256xf32>
    %6 = arith.mulf %4, %5 : vector<4x256xf32>
    %7 = vector.extract_strided_slice %1 {offsets = [0, 1], sizes = [4, 1], strides = [1, 1]} : vector<4x4xf32> to vector<4x1xf32>
    %8 = vector.extract_strided_slice %0 {offsets = [1, 0], sizes = [1, 256], strides = [1, 1]} : vector<4x256xf32> to vector<1x256xf32>
    %9 = vector.broadcast %7 : vector<4x1xf32> to vector<4x256xf32>
    %10 = vector.broadcast %8 : vector<1x256xf32> to vector<4x256xf32>
    %11 = arith.mulf %9, %10 : vector<4x256xf32>
    %12 = arith.addf %6, %11 : vector<4x256xf32>
    %13 = vector.extract_strided_slice %1 {offsets = [0, 2], sizes = [4, 1], strides = [1, 1]} : vector<4x4xf32> to vector<4x1xf32>
    %14 = vector.extract_strided_slice %0 {offsets = [2, 0], sizes = [1, 256], strides = [1, 1]} : vector<4x256xf32> to vector<1x256xf32>
    %15 = vector.broadcast %13 : vector<4x1xf32> to vector<4x256xf32>
    %16 = vector.broadcast %14 : vector<1x256xf32> to vector<4x256xf32>
    %17 = arith.mulf %15, %16 : vector<4x256xf32>
    %18 = arith.addf %12, %17 : vector<4x256xf32>
    %19 = vector.extract_strided_slice %1 {offsets = [0, 3], sizes = [4, 1], strides = [1, 1]} : vector<4x4xf32> to vector<4x1xf32>
    %20 = vector.extract_strided_slice %0 {offsets = [3, 0], sizes = [1, 256], strides = [1, 1]} : vector<4x256xf32> to vector<1x256xf32>
    %21 = vector.broadcast %19 : vector<4x1xf32> to vector<4x256xf32>
    %22 = vector.broadcast %20 : vector<1x256xf32> to vector<4x256xf32>
    %23 = arith.mulf %21, %22 : vector<4x256xf32>
    %24 = arith.addf %18, %23 : vector<4x256xf32>
    %c0_3 = arith.constant 0 : index
    %c0_4 = arith.constant 0 : index
    %25 = vector.load %arg3[%c0_3, %c0_4] : memref<4x1xf32, #tpu.memory_space<vmem>>, vector<4x1xf32>
    %26 = vector.broadcast %25 : vector<4x1xf32> to vector<4x256xf32>
    %27 = arith.addf %24, %26 : vector<4x256xf32>
    %c0_5 = arith.constant 0 : index
    %c0_6 = arith.constant 0 : index
    %28 = vector.load %arg4[%c0_5, %c0_6] : memref<4x256xf32, #tpu.memory_space<vmem>>, vector<4x256xf32>
    tpu.vector_store %arg4[%c0_5, %c0_6], %27 {strides = array<i32>} : memref<4x256xf32, #tpu.memory_space<vmem>>, vector<4x256xf32>,
    return
  }
  func.func @transform_0(%arg0: i32) -> (i32, i32) {
    %c0_i32 = arith.constant 0 : i32
    %c0_i32_0 = arith.constant 0 : i32
    return %c0_i32, %arg0 : i32, i32
  }
  func.func @transform_1(%arg0: i32) -> (i32, i32) {
    %c0_i32 = arith.constant 0 : i32
    %c0_i32_0 = arith.constant 0 : i32
    %c0_i32_1 = arith.constant 0 : i32
    return %c0_i32, %c0_i32_0 : i32, i32
  }
  func.func @transform_2(%arg0: i32) -> (i32, i32) {
    %c0_i32 = arith.constant 0 : i32
    %c0_i32_0 = arith.constant 0 : i32
    %c0_i32_1 = arith.constant 0 : i32
    return %c0_i32, %c0_i32_0 : i32, i32
  }
  func.func @transform_3(%arg0: i32) -> (i32, i32) {
    %c0_i32 = arith.constant 0 : i32
    %c0_i32_0 = arith.constant 0 : i32
    return %c0_i32, %arg0 : i32, i32
  }
}

</mosaic_0001>

<bundles_post_ra>
// kernel: tpu_custom_call.1
= control target key start
LH: loop header
LB: loop body
LE: loop exit
PB: predicated region body
PF: predicated region fallthrough
CT: control target
= control target key end

     0   :  { %8 = vsyncpa [#allocation3], 0  ;;  %s277_s0 = inlined_call_operand.hbm [shape: f32[4,256], index: 0, kind: input, shape index: {}]   ;;  %s278_s1 = inlined_call_operand.vmem [shape: f32[4,4], index: 1, kind: input, shape index: {}]   ;;  %s279_s2 = inlined_call_operand.vmem [shape: f32[4,1], index: 2, kind: input, shape index: {}]   ;;  %s280_s3 = inlined_call_operand.hbm [shape: f32[4,256], index: 3, kind: output, shape index: {}]  }
   0x1   :  { %9 = vsyncpa [#allocation4], 0  ;;  %s221_s12 = smov [#allocation2]   ;;  %s173_s16 = scalar_lea.hbm %s277_s0, 128 }
   0x2   :  { %s16_s13 = sshll.u32 %s221_s12, 4  ;;  %p174_p0 = scmp.ne.s32.totalorder %s277_s0, %s173_s16  ;;  %s17_s13 = int_to_ptr.vmem [resolvable:$true] %s16_s13 }
   0x3   :  { %p177_p1 = scmp.lt.u32.totalorder %s173_s16, %s277_s0 }
   0x5   :  { %p179_p2 = pnand %p177_p1, %p174_p0 }
   0x7   :  { %182 = shalt.err (!%p179_p2)
}
   0x8   :  { %s183_s21 = scalar_lea.vmem %s17_s13, 128  ;;  %p188_p4 = scmp.lt.s32.totalorder %s17_s13, %s17_s13 }
   0x9   :  { %p184_p3 = scmp.ne.s32.totalorder %s17_s13, %s183_s21  ;;  %p189_p5 = scmp.lt.s32.totalorder %s183_s21, %s183_s21 }
   0xb   :  { %p190_p6 = por %p189_p5, %p188_p4 }
   0xd   :  { %p191_p7 = pnand %p190_p6, %p184_p3 }
   0xf   :  { %194 = shalt.err (!%p191_p7)
}
  0x10   :  { %19 = dma.hbm_to_vmem [thread:$0]  %s277_s0, 128, %s17_s13, [#allocation3]  }
  0x11   :  { %217 = dma.done.wait [#allocation3], 128  }
  0x12   :  { %218 = vsyncadd [#allocation3], 4294967168  ;;  %v222_v0 = vmov 0   ;;  %v223_v1 = vmov 2   ;;  %v28_v2 = vld [vmem:[%s278_s1] sm:$0xf]  ;;  %v35_v6 = vlaneseq }
  0x13   :  { %167 = vset.pattern.permute.xlu0 %v222_v0  ;;  %169 = vset.pattern.permute.xlu1 %v223_v1  ;;  %v224_v3 = vmov 1   ;;  %v225_v4 = vmov 3   ;;  %v133_v5 = vld [vmem:[%s279_s2] sm:$0xf]  ;;  %s226_s1 = smov [#allocation5]  }
  0x14   :  { %31 = vperm.xlu0 %167, %v28_v2   ;;  %82 = vperm.xlu1 %169, %v28_v2   ;;  %v36_v7 = vshrl.u32 %v35_v6, 7  ;;  %v27_v12 = vld [vmem:[#allocation2] sm:$0xff]  ;;  %s152_s2 = sshll.u32 %s226_s1, 4  ;;  %s153_s2 = int_to_ptr.vmem [resolvable:$true] %s152_s2 }
  0x15   :  { %s195_s27 = scalar_lea.vmem %s153_s2, 128  ;;  %p200_p9 = scmp.lt.s32.totalorder %s153_s2, %s153_s2 }
  0x16   :  { %v37_v8 = vsub.s32 0, %v36_v7  ;;  %v41_v9 = vsub.s32 4, %v36_v7  ;;  %v61_v10 = vsub.s32 1, %v36_v7  ;;  %v65_v11 = vsub.s32 5, %v36_v7  ;;  %p196_p8 = scmp.ne.s32.totalorder %s153_s2, %s195_s27  ;;  %p201_p10 = scmp.lt.s32.totalorder %s195_s27, %s195_s27 }
  0x17   :  { %v87_v13 = vsub.s32 2, %v36_v7  ;;  %v91_v14 = vsub.s32 6, %v36_v7  ;;  %v113_v15 = vsub.s32 3, %v36_v7  ;;  %v117_v16 = vsub.s32 7, %v36_v7 }
  0x18   :  { %168 = vset.pattern.permute.xlu0 %v224_v3  ;;  %170 = vset.pattern.permute.xlu1 %v225_v4  ;;  %v38_v17 = vrot.slane %v27_v12, %v37_v8  ;;  %v42_v18 = vrot.slane %v27_v12, %v41_v9  ;;  %v62_v19 = vrot.slane %v27_v12, %v61_v10  ;;  %p202_p11 = por %p201_p10, %p200_p9 }
  0x19   :  { %56 = vperm.xlu0 %168, %v28_v2   ;;  %108 = vperm.xlu1 %170, %v28_v2   ;;  %v66_v20 = vrot.slane %v27_v12, %v65_v11  ;;  %v88_v21 = vrot.slane %v27_v12, %v87_v13  ;;  %v92_v22 = vrot.slane %v27_v12, %v91_v14 }
  0x1a   :  { %v114_v25 = vrot.slane %v27_v12, %v113_v15  ;;  %v118_v26 = vrot.slane %v27_v12, %v117_v16  ;;  %v48_v27 = vrot.slane %v38_v17, %v37_v8  ;;  %v52_v28 = vrot.slane %v42_v18, %v37_v8  ;;  %p203_p12 = pnand %p202_p11, %p196_p8 }
  0x1b   :  { %v72_v29 = vrot.slane %v62_v19, %v61_v10  ;;  %v76_v30 = vrot.slane %v66_v20, %v61_v10  ;;  %v98_v31 = vrot.slane %v88_v21, %v87_v13  ;;  %v102_v32 = vrot.slane %v92_v22, %v87_v13 }
  0x1c   :  { %v124_v33 = vrot.slane %v114_v25, %v113_v15  ;;  %v128_v34 = vrot.slane %v118_v26, %v113_v15 }
  0x1d   :  { %171 = vset.pattern.permute.xlu1 %v222_v0  ;;  %172 = vset.pattern.permute.xlu0 %v222_v0 }
  0x1e   :  { %136 = vperm.xlu1 %171, %v133_v5  }
  0x93   :  { %v32_v23 = vpop.permute.xlu0 %31  ;;  %v83_v24 = vpop.permute.xlu1 %82 }
  0x94   :  { %v53_v37 = vmul.f32 %v48_v27, %v32_v23  ;;  %v54_v38 = vmul.f32 %v52_v28, %v32_v23  ;;  %v103_v41 = vmul.f32 %v98_v31, %v83_v24  ;;  %v104_v42 = vmul.f32 %v102_v32, %v83_v24 }
  0x98   :  { %v57_v35 = vpop.permute.xlu0 %56  ;;  %v109_v36 = vpop.permute.xlu1 %108 }
  0x99   :  { %v77_v39 = vmul.f32 %v72_v29, %v57_v35  ;;  %v78_v40 = vmul.f32 %v76_v30, %v57_v35  ;;  %v129_v45 = vmul.f32 %v124_v33, %v109_v36  ;;  %v130_v46 = vmul.f32 %v128_v34, %v109_v36 }
  0x9b   :  { %v79_v43 = vadd.f32 %v77_v39, %v53_v37  ;;  %v80_v44 = vadd.f32 %v78_v40, %v54_v38 }
  0x9d   :  { %v105_v47 = vadd.f32 %v103_v41, %v79_v43  ;;  %v106_v48 = vadd.f32 %v104_v42, %v80_v44  ;;  %v137_v49 = vpop.permute.xlu1 %136 }
  0x9f   :  { %v131_v50 = vadd.f32 %v129_v45, %v105_v47  ;;  %v132_v51 = vadd.f32 %v130_v46, %v106_v48 }
  0xa1   :  { %v139_v52 = vadd.f32 %v137_v49, %v131_v50  ;;  %v140_v53 = vadd.f32 %v137_v49, %v132_v51 }
  0xa3   :  { %v143_v54 = vcombine.low %v139_v52, %v140_v53 }
  0xa5   :  { %145 = vst [vmem:[#allocation5] sm:$0xff] %v143_v54 }
  0xa6   :  { %206 = shalt.err (!%p203_p12)
}
  0xa7   :  { %s207_s30 = scalar_lea.hbm %s280_s3, 128 }
  0xa8   :  { %p208_p13 = scmp.ne.s32.totalorder %s280_s3, %s207_s30  ;;  %p211_p0 = scmp.lt.u32.totalorder %s207_s30, %s280_s3 }
  0xaa   :  { %p213_p1 = pnand %p211_p0, %p208_p13 }
  0xac   :  { %216 = shalt.err (!%p213_p1)
}
  0xad   :  { %155 = dma.vmem_to_hbm [thread:$0]  %s153_s2, 128, %s280_s3, [#allocation4]  }
  0xae   :  { %219 = dma.done.wait [#allocation4], 128  }
  0xaf   :  { %220 = vsyncadd [#allocation4], 4294967168 }
  0xb0   :  { %159 = vsyncpa [#allocation3], 1 }
  0xb1   :  { %160 = vsyncpa [#allocation4], 1 }

</bundles_post_ra>
